<compile_context>
chip_gen: v6e
topology: v6e:2x2x1
jax: 0.10.0
libtpu: 0.0.40
codegen_flags: <defaults>
</compile_context>

<pallas_src>
import jax
import jax.numpy as jnp
from jax.experimental import pallas as pl
from jax.experimental.pallas import tpu as pltpu


def _round_up(x, m):
    return (x + m - 1) // m * m


def dnn_kernel(xT_ref, w1T_ref, b1_ref, w2T_ref, b2_ref, o_ref):
    # fc1 (transposed): (hidden, n_state) @ (n_state, tb) -> (hidden, tb),
    # f32 accumulation on the MXU.
    h = jnp.dot(w1T_ref[...], xT_ref[...], preferred_element_type=jnp.float32)
    # bias + ReLU in f32 on the VPU; b1 is (hidden, 1) and broadcasts over lanes.
    h = jnp.maximum(h + b1_ref[...], 0.0)
    # Keep h in the compute dtype for fc2 (halves h vreg/VMEM bytes in bf16).
    h = h.astype(w2T_ref.dtype)
    # fc2 (transposed): (n_out, hidden) @ (hidden, tb) -> (n_out, tb).
    y = jnp.dot(w2T_ref[...], h, preferred_element_type=jnp.float32)
    o_ref[...] = (y + b2_ref[...]).astype(o_ref.dtype)


def dnn_forward(x, w1, b1, w2, b2, *, tb=4096, compute_dtype=jnp.bfloat16):
    """Forward pass of DNNNet: relu(x @ w1 + b1) @ w2 + b2 -> [B, n_action] f32.

    x:  [B, n_state]        w1: [n_state, hidden]   b1: [hidden]
    w2: [hidden, n_action]  b2: [n_action]

    The kernel runs in the transposed domain (batch on the lane axis) so the
    output stays lane-dense without padding n_action to 128.
    NOTE: bf16 compute (default) casts x/W to bf16; pass compute_dtype=float32
    for full input precision.
    """
    B, n_state = x.shape
    hidden = w1.shape[1]
    n_action = w2.shape[1]
    assert w1.shape == (n_state, hidden)
    assert w2.shape == (hidden, n_action)
    assert b1.shape == (hidden,)
    assert b2.shape == (n_action,)

    # ---- output rows: pad n_action only to a sublane multiple (8) ----------
    n_out = _round_up(n_action, 8)

    # ---- batch tile (lane axis): multiple of 128, amortize per-step overhead
    tb = _round_up(max(128, min(int(tb), 4096)), 128)
    b_ceil = _round_up(B, 128)
    tb = min(tb, b_ceil)
    # v7x megacore: keep >= 2 grid steps when the batch is large enough so
    # the second TensorCore is not idle.
    if b_ceil // tb < 2 and tb >= 256:
        tb = _round_up(pl.cdiv(b_ceil, 2), 128)
    b_pad = _round_up(B, tb)

    # ---- wrapper-side layout plumbing (all tiny ops) ------------------------
    if b_pad != B:
        x = jnp.pad(x, ((0, b_pad - B), (0, 0)))
    xT = x.T.astype(compute_dtype)                      # [n_state, b_pad]
    w1T = w1.T.astype(compute_dtype)                    # [hidden, n_state]
    w2T = w2.T.astype(compute_dtype)                    # [n_action, hidden]
    b2c = b2.astype(jnp.float32)
    if n_out != n_action:
        w2T = jnp.pad(w2T, ((0, n_out - n_action), (0, 0)))
        b2c = jnp.pad(b2c, (0, n_out - n_action))
    b1c = b1.astype(jnp.float32).reshape(hidden, 1)
    b2c = b2c.reshape(n_out, 1)

    grid = (b_pad // tb,)
    outT = pl.pallas_call(
        dnn_kernel,
        out_shape=jax.ShapeDtypeStruct((n_out, b_pad), jnp.float32),
        grid_spec=pltpu.PrefetchScalarGridSpec(
            num_scalar_prefetch=0,
            grid=grid,
            in_specs=[
                # activations: one batch tile per grid step (auto double-buffered)
                pl.BlockSpec((n_state, tb), lambda i: (0, i)),
                # weights / biases: same block every step -> VMEM-resident
                pl.BlockSpec((hidden, n_state), lambda i: (0, 0)),
                pl.BlockSpec((hidden, 1), lambda i: (0, 0)),
                pl.BlockSpec((n_out, hidden), lambda i: (0, 0)),
                pl.BlockSpec((n_out, 1), lambda i: (0, 0)),
            ],
            out_specs=pl.BlockSpec((n_out, tb), lambda i: (0, i)),
        ),
        compiler_params=pltpu.CompilerParams(
            # batch tiles are independent -> shardable across v7x's two TCs.
            # TODO(synk): evaluate pltpu.CORE_PARALLEL on v7x-only builds.
            dimension_semantics=("parallel",),
            # ~13 MiB used at tb=4096 bf16 (f32 h is the big term); 32 MiB is
            # safe on v5e/v6e (128 MiB physical) and equals v7x's scoped default.
            vmem_limit_bytes=32 * 1024 * 1024,
        ),
    )(xT, w1T, b1c, w2T, b2c)

    # Only (n_action, B) real values exist -> this slice + transpose is tiny
    # (B x n_action floats), unlike the old (b_pad, 128) f32 re-read.
    return outT[:n_action, :B].T


def init_params(key, n_state, n_action, hidden=512):
    """Synthetic init mirroring DNNNet.__init__: weights ~ N(0, 0.1), biases use
    PyTorch's default Linear bias init (U[-1/sqrt(fan_in), 1/sqrt(fan_in)])."""
    k1, k2, k3, k4 = jax.random.split(key, 4)
    # PyTorch stores weight as [out, in]; we keep [in, out] for the wrapper.
    w1 = 0.1 * jax.random.normal(k1, (n_state, hidden), dtype=jnp.float32)
    w2 = 0.1 * jax.random.normal(k2, (hidden, n_action), dtype=jnp.float32)
    bnd1 = 1.0 / jnp.sqrt(jnp.float32(n_state))
    bnd2 = 1.0 / jnp.sqrt(jnp.float32(hidden))
    b1 = jax.random.uniform(k3, (hidden,), jnp.float32, -bnd1, bnd1)
    b2 = jax.random.uniform(k4, (n_action,), jnp.float32, -bnd2, bnd2)
    return w1, b1, w2, b2


def reference_forward(x, w1, b1, w2, b2):
    hi = jax.lax.Precision.HIGHEST
    h = jnp.maximum(jnp.dot(x, w1, precision=hi) + b1, 0.0)
    return jnp.dot(h, w2, precision=hi) + b2


if __name__ == "__main__":
    key = jax.random.PRNGKey(0)
    kx, kp, kx2 = jax.random.split(key, 3)

    n_state, n_action = 16, 4
    w1, b1, w2, b2 = init_params(kp, n_state, n_action)

    # --- small RL-style shape (batch=2), f32 compute, tight-ish check --------
    x = jax.random.normal(kx, (2, n_state), dtype=jnp.float32)
    out = jax.block_until_ready(
        dnn_forward(x, w1, b1, w2, b2, compute_dtype=jnp.float32))
    ref = reference_forward(x, w1, b1, w2, b2)
    assert out.shape == (2, n_action)
    assert jnp.allclose(out, ref, atol=1e-3, rtol=1e-3)

    # --- larger batch exercising the grid (2 tiles + tail padding), f32 ------
    x2 = jax.random.normal(kx2, (300, n_state), dtype=jnp.float32)
    out2 = jax.block_until_ready(
        dnn_forward(x2, w1, b1, w2, b2, tb=256, compute_dtype=jnp.float32))
    ref2 = reference_forward(x2, w1, b1, w2, b2)
    assert out2.shape == (300, n_action)
    assert jnp.allclose(out2, ref2, atol=1e-3, rtol=1e-3)

    # --- default path (bf16 compute, the fast path on all gens), loose check -
    out3 = jax.block_until_ready(dnn_forward(x2, w1, b1, w2, b2))
    assert out3.shape == (300, n_action)
    assert jnp.allclose(out3, ref2, atol=5e-2, rtol=5e-2)

    print("KERNEL_OK")
</pallas_src>

<mosaic_0001>
module attributes {stable_mosaic.version = 11 : i64} {
  func.func @dnn_kernel(%arg0: i32, %arg1: memref<16x128xf32, #tpu.memory_space<vmem>>, %arg2: memref<512x16xf32, #tpu.memory_space<vmem>>, %arg3: memref<512x1xf32, #tpu.memory_space<vmem>>, %arg4: memref<8x512xf32, #tpu.memory_space<vmem>>, %arg5: memref<8x1xf32, #tpu.memory_space<vmem>>, %arg6: memref<8x128xf32, #tpu.memory_space<vmem>>) attributes {dimension_semantics = [#tpu.dimension_semantics<parallel>], iteration_bounds = array<i64: 1>, scalar_prefetch = 0 : i64, scratch_operands = 0 : i64, tpu.core_type = #tpu.core_type<tc>, window_params = [{transform_indices = @transform_0, window_bounds = array<i64: 16, 128>}, {pipeline_mode = #tpu.pipeline_mode<synchronous>, transform_indices = @transform_1, window_bounds = array<i64: 512, 16>}, {pipeline_mode = #tpu.pipeline_mode<synchronous>, transform_indices = @transform_2, window_bounds = array<i64: 512, 1>}, {pipeline_mode = #tpu.pipeline_mode<synchronous>, transform_indices = @transform_3, window_bounds = array<i64: 8, 512>}, {pipeline_mode = #tpu.pipeline_mode<synchronous>, transform_indices = @transform_4, window_bounds = array<i64: 8, 1>}, {transform_indices = @transform_5, window_bounds = array<i64: 8, 128>}]} {
    %c0 = arith.constant 0 : index
    %c0_0 = arith.constant 0 : index
    %0 = vector.load %arg2[%c0, %c0_0] : memref<512x16xf32, #tpu.memory_space<vmem>>, vector<512x16xf32>
    %c0_1 = arith.constant 0 : index
    %c0_2 = arith.constant 0 : index
    %1 = vector.load %arg1[%c0_1, %c0_2] : memref<16x128xf32, #tpu.memory_space<vmem>>, vector<16x128xf32>
    %cst = arith.constant dense<0.000000e+00> : vector<512x128xf32>
    %2 = tpu.matmul %0, %1, %cst {dimension_numbers = #tpu.dot_dimension_numbers<[1], [0], [0], [1], [0, 0, 1, 1], [], []>} : vector<512x16xf32>, vector<16x128xf32>, vector<512x128xf32> -> vector<512x128xf32>
    %c0_3 = arith.constant 0 : index
    %c0_4 = arith.constant 0 : index
    %3 = vector.load %arg3[%c0_3, %c0_4] : memref<512x1xf32, #tpu.memory_space<vmem>>, vector<512x1xf32>
    %4 = vector.broadcast %3 : vector<512x1xf32> to vector<512x128xf32>
    %5 = arith.addf %2, %4 : vector<512x128xf32>
    %cst_5 = arith.constant 0.000000e+00 : f32
    %6 = vector.broadcast %cst_5 : f32 to vector<512x128xf32>
    %7 = arith.maximumf %5, %6 : vector<512x128xf32>
    %c0_6 = arith.constant 0 : index
    %c0_7 = arith.constant 0 : index
    %8 = vector.load %arg4[%c0_6, %c0_7] : memref<8x512xf32, #tpu.memory_space<vmem>>, vector<8x512xf32>
    %cst_8 = arith.constant dense<0.000000e+00> : vector<8x128xf32>
    %9 = tpu.matmul %8, %7, %cst_8 {dimension_numbers = #tpu.dot_dimension_numbers<[1], [0], [0], [1], [0, 0, 1, 1], [], []>} : vector<8x512xf32>, vector<512x128xf32>, vector<8x128xf32> -> vector<8x128xf32>
    %c0_9 = arith.constant 0 : index
    %c0_10 = arith.constant 0 : index
    %10 = vector.load %arg5[%c0_9, %c0_10] : memref<8x1xf32, #tpu.memory_space<vmem>>, vector<8x1xf32>
    %11 = vector.broadcast %10 : vector<8x1xf32> to vector<8x128xf32>
    %12 = arith.addf %9, %11 : vector<8x128xf32>
    %c0_11 = arith.constant 0 : index
    %c0_12 = arith.constant 0 : index
    %13 = vector.load %arg6[%c0_11, %c0_12] : memref<8x128xf32, #tpu.memory_space<vmem>>, vector<8x128xf32>
    tpu.vector_store %arg6[%c0_11, %c0_12], %12 {strides = array<i32>} : memref<8x128xf32, #tpu.memory_space<vmem>>, vector<8x128xf32>,
    return
  }
  func.func @transform_0(%arg0: i32) -> (i32, i32) {
    %c0_i32 = arith.constant 0 : i32
    %c0_i32_0 = arith.constant 0 : i32
    return %c0_i32, %arg0 : i32, i32
  }
  func.func @transform_1(%arg0: i32) -> (i32, i32) {
    %c0_i32 = arith.constant 0 : i32
    %c0_i32_0 = arith.constant 0 : i32
    %c0_i32_1 = arith.constant 0 : i32
    return %c0_i32, %c0_i32_0 : i32, i32
  }
  func.func @transform_2(%arg0: i32) -> (i32, i32) {
    %c0_i32 = arith.constant 0 : i32
    %c0_i32_0 = arith.constant 0 : i32
    %c0_i32_1 = arith.constant 0 : i32
    return %c0_i32, %c0_i32_0 : i32, i32
  }
  func.func @transform_3(%arg0: i32) -> (i32, i32) {
    %c0_i32 = arith.constant 0 : i32
    %c0_i32_0 = arith.constant 0 : i32
    %c0_i32_1 = arith.constant 0 : i32
    return %c0_i32, %c0_i32_0 : i32, i32
  }
  func.func @transform_4(%arg0: i32) -> (i32, i32) {
    %c0_i32 = arith.constant 0 : i32
    %c0_i32_0 = arith.constant 0 : i32
    %c0_i32_1 = arith.constant 0 : i32
    return %c0_i32, %c0_i32_0 : i32, i32
  }
  func.func @transform_5(%arg0: i32) -> (i32, i32) {
    %c0_i32 = arith.constant 0 : i32
    %c0_i32_0 = arith.constant 0 : i32
    return %c0_i32, %arg0 : i32, i32
  }
}

</mosaic_0001>

<bundles_post_ra>
// kernel: tpu_custom_call.1
= control target key start
LH: loop header
LB: loop body
LE: loop exit
PB: predicated region body
PF: predicated region fallthrough
CT: control target
= control target key end

     0   :  { %v1608_v3 = vmov 0   ;;  %vm471_vm0 = vcmask 130048   ;;  %s2412_s0 = inlined_call_operand.vmem [shape: f32[16,128], index: 0, kind: input, shape index: {}]   ;;  %s2413_s1 = inlined_call_operand.vmem [shape: f32[512,16], index: 1, kind: input, shape index: {}]   ;;  %s2414_s2 = inlined_call_operand.vmem [shape: f32[512,1], index: 2, kind: input, shape index: {}]   ;;  %s2415_s3 = inlined_call_operand.vmem [shape: f32[8,512], index: 3, kind: input, shape index: {}]   ;;  %s2416_s4 = inlined_call_operand.vmem [shape: f32[8,1], index: 4, kind: input, shape index: {}]   ;;  %s2417_s5 = inlined_call_operand.hbm [shape: f32[8,128], index: 5, kind: output, shape index: {}]  }
   0x1   :  { %v86_v0 = vld [vmem:[%s2412_s0 + $0x8] sm:$0xff]  ;;  %v118_v1 = vld [vmem:[%s2414_s2 + $0xf8] sm:$0xff]  ;;  %v117_v2 = vld [vmem:[%s2414_s2 + $0xf0] sm:$0xff]  ;;  %1585 = vset.pattern.permute.xlu1 %v1608_v3  ;;  %1584 = vset.pattern.permute.xlu0 %v1608_v3 }
   0x2   :  { %1478 = vmatprep.subr.mxu0 %v86_v0  ;;  %1578 = vmatprep.subr.mxu1 %v86_v0  ;;  %v85_v4 = vld [vmem:[%s2412_s0] sm:$0xff]  ;;  %v63_v6 = vld [vmem:[%s2413_s1 + $0x150] sm:$0xff]  ;;  %v22_v7 = vld [vmem:[%s2413_s1 + $0x8] sm:$0xff] }
   0x3   :  { %308 = vperm.xlu0 %1584, %v118_v1   ;;  %303 = vperm.xlu1 %1585, %v117_v2   ;;  %v21_v5 = vld [vmem:[%s2413_s1] sm:$0xff]  ;;  %v64_v8 = vld [vmem:[%s2413_s1 + $0x158] sm:$0xff]  ;;  %v101_v10 = vld [vmem:[%s2414_s2 + $0x70] sm:$0xff] }
   0x4   :  { %1479 = vmatpush3.msra.mxu0 %v86_v0  ;;  %1580 = vmatpush3.msra.mxu1 %v86_v0  ;;  %v102_v9 = vld [vmem:[%s2414_s2 + $0x78] sm:$0xff]  ;;  %v23_v11 = vld [vmem:[%s2413_s1 + $0x10] sm:$0xff]  ;;  %v65_v12 = vld [vmem:[%s2413_s1 + $0x160] sm:$0xff] }
   0x5   :  { %1480 = vmatprep.subr.mxu0 %v85_v4  ;;  %1579 = vmatprep.subr.mxu1 %v85_v4  ;;  %v24_v13 = vld [vmem:[%s2413_s1 + $0x18] sm:$0xff]  ;;  %v66_v14 = vld [vmem:[%s2413_s1 + $0x168] sm:$0xff]  ;;  %v25_v17 = vld [vmem:[%s2413_s1 + $0x20] sm:$0xff] }
   0x6   :  { %1481 = vmatpush3.msra.mxu0 %v85_v4  ;;  %1581 = vmatpush3.msra.mxu1 %v85_v4  ;;  %v116_v15 = vld [vmem:[%s2414_s2 + $0xe8] sm:$0xff]  ;;  %v67_v18 = vld [vmem:[%s2413_s1 + $0x170] sm:$0xff]  ;;  %v68_v20 = vld [vmem:[%s2413_s1 + $0x178] sm:$0xff] }
   0x7   :  { %1482 = vmatprep.mubr.msk.f32.mxu0 %vm471_vm0, %v21_v5  ;;  %1545 = vmatprep.mubr.msk.f32.mxu1 %vm471_vm0, %v63_v6  ;;  %v100_v16 = vld [vmem:[%s2414_s2 + $0x68] sm:$0xff]  ;;  %v115_v21 = vld [vmem:[%s2414_s2 + $0xe0] sm:$0xff]  ;;  %v27_v23 = vld [vmem:[%s2413_s1 + $0x30] sm:$0xff] }
   0x8   :  { %1483 = vmatmul.mubr.msk.f32.vlgmr.msra.gmra.mxu0 %vm471_vm0, %v22_v7  ;;  %1546 = vmatmul.mubr.msk.f32.vlgmr.msra.gmra.mxu1 %vm471_vm0, %v64_v8  ;;  %v26_v19 = vld [vmem:[%s2413_s1 + $0x28] sm:$0xff]  ;;  %v99_v22 = vld [vmem:[%s2414_s2 + $0x60] sm:$0xff]  ;;  %v28_v25 = vld [vmem:[%s2413_s1 + $0x38] sm:$0xff] }
   0x9   :  { %228 = vperm.xlu0 %1584, %v102_v9   ;;  %223 = vperm.xlu1 %1585, %v101_v10   ;;  %v69_v24 = vld [vmem:[%s2413_s1 + $0x180] sm:$0xff]  ;;  %v70_v26 = vld [vmem:[%s2413_s1 + $0x188] sm:$0xff]  ;;  %v114_v27 = vld [vmem:[%s2414_s2 + $0xd8] sm:$0xff] }
   0xa   :  { %1485 = vmatprep.mubr.msk.f32.mxu0 %vm471_vm0, %v23_v11  ;;  %1548 = vmatprep.mubr.msk.f32.mxu1 %vm471_vm0, %v65_v12  ;;  %v98_v28 = vld [vmem:[%s2414_s2 + $0x58] sm:$0xff]  ;;  %v29_v29 = vld [vmem:[%s2413_s1 + $0x40] sm:$0xff]  ;;  %v71_v30 = vld [vmem:[%s2413_s1 + $0x190] sm:$0xff] }
   0xb   :  { %v30_v31 = vld [vmem:[%s2413_s1 + $0x48] sm:$0xff]  ;;  %v72_v32 = vld [vmem:[%s2413_s1 + $0x198] sm:$0xff]  ;;  %v113_v33 = vld [vmem:[%s2414_s2 + $0xd0] sm:$0xff] }
   0xc   :  { %1486 = vmatmul.mubr.msk.f32.gmra.mxu0 %vm471_vm0, %v24_v13  ;;  %1549 = vmatmul.mubr.msk.f32.gmra.mxu1 %vm471_vm0, %v66_v14  ;;  %v97_v34 = vld [vmem:[%s2414_s2 + $0x50] sm:$0xff]  ;;  %v73_v36 = vld [vmem:[%s2413_s1 + $0x1a0] sm:$0xff]  ;;  %v32_v37 = vld [vmem:[%s2413_s1 + $0x58] sm:$0xff] }
   0xd   :  { %298 = vperm.xlu0 %1584, %v116_v15   ;;  %218 = vperm.xlu1 %1585, %v100_v16   ;;  %v31_v35 = vld [vmem:[%s2413_s1 + $0x50] sm:$0xff]  ;;  %v74_v38 = vld [vmem:[%s2413_s1 + $0x1a8] sm:$0xff]  ;;  %v33_v41 = vld [vmem:[%s2413_s1 + $0x60] sm:$0xff] }
   0xe   :  { %1488 = vmatprep.mubr.msk.f32.mxu0 %vm471_vm0, %v25_v17  ;;  %1551 = vmatprep.mubr.msk.f32.mxu1 %vm471_vm0, %v67_v18  ;;  %v112_v39 = vld [vmem:[%s2414_s2 + $0xc8] sm:$0xff]  ;;  %v75_v42 = vld [vmem:[%s2413_s1 + $0x1b0] sm:$0xff]  ;;  %v76_v44 = vld [vmem:[%s2413_s1 + $0x1b8] sm:$0xff] }
   0xf   :  { %v96_v40 = vld [vmem:[%s2414_s2 + $0x48] sm:$0xff]  ;;  %v111_v45 = vld [vmem:[%s2414_s2 + $0xc0] sm:$0xff]  ;;  %v35_v47 = vld [vmem:[%s2413_s1 + $0x70] sm:$0xff] }
  0x10   :  { %1489 = vmatmul.mubr.msk.f32.gmra.mxu0 %vm471_vm0, %v26_v19  ;;  %1552 = vmatmul.mubr.msk.f32.gmra.mxu1 %vm471_vm0, %v68_v20  ;;  %v34_v43 = vld [vmem:[%s2413_s1 + $0x68] sm:$0xff]  ;;  %v95_v46 = vld [vmem:[%s2414_s2 + $0x40] sm:$0xff]  ;;  %v36_v49 = vld [vmem:[%s2413_s1 + $0x78] sm:$0xff] }
  0x11   :  { %293 = vperm.xlu0 %1584, %v115_v21   ;;  %213 = vperm.xlu1 %1585, %v99_v22   ;;  %v77_v48 = vld [vmem:[%s2413_s1 + $0x1c0] sm:$0xff]  ;;  %v78_v50 = vld [vmem:[%s2413_s1 + $0x1c8] sm:$0xff]  ;;  %v110_v51 = vld [vmem:[%s2414_s2 + $0xb8] sm:$0xff] }
  0x12   :  { %1491 = vmatprep.mubr.msk.f32.mxu0 %vm471_vm0, %v27_v23  ;;  %1554 = vmatprep.mubr.msk.f32.mxu1 %vm471_vm0, %v69_v24  ;;  %v94_v52 = vld [vmem:[%s2414_s2 + $0x38] sm:$0xff]  ;;  %v37_v53 = vld [vmem:[%s2413_s1 + $0x80] sm:$0xff]  ;;  %v79_v54 = vld [vmem:[%s2413_s1 + $0x1d0] sm:$0xff] }
  0x13   :  { %v38_v55 = vld [vmem:[%s2413_s1 + $0x88] sm:$0xff]  ;;  %v80_v56 = vld [vmem:[%s2413_s1 + $0x1d8] sm:$0xff]  ;;  %v109_v57 = vld [vmem:[%s2414_s2 + $0xb0] sm:$0xff] }
  0x14   :  { %1492 = vmatmul.mubr.msk.f32.gmra.mxu0 %vm471_vm0, %v28_v25  ;;  %1555 = vmatmul.mubr.msk.f32.gmra.mxu1 %vm471_vm0, %v70_v26  ;;  %v93_v58 = vld [vmem:[%s2414_s2 + $0x30] sm:$0xff]  ;;  %v81_v60 = vld [vmem:[%s2413_s1 + $0x1e0] sm:$0xff]  ;;  %v40_v61 = vld [vmem:[%s2413_s1 + $0x98] sm:$0xff] }
  0x15   :  { %288 = vperm.xlu0 %1584, %v114_v27   ;;  %208 = vperm.xlu1 %1585, %v98_v28   ;;  %v39_v59 = vld [vmem:[%s2413_s1 + $0x90] sm:$0xff]  ;;  %v82_v62 = vld [vmem:[%s2413_s1 + $0x1e8] sm:$0xff]  ;;  %v41_v1 = vld [vmem:[%s2413_s1 + $0xa0] sm:$0xff] }
  0x16   :  { %1494 = vmatprep.mubr.msk.f32.mxu0 %vm471_vm0, %v29_v29  ;;  %1557 = vmatprep.mubr.msk.f32.mxu1 %vm471_vm0, %v71_v30  ;;  %v108_v63 = vld [vmem:[%s2414_s2 + $0xa8] sm:$0xff]  ;;  %v83_v2 = vld [vmem:[%s2413_s1 + $0x1f0] sm:$0xff] }
  0x17   :  { %v92_v0 = vld [vmem:[%s2414_s2 + $0x28] sm:$0xff] }
  0x18   :  { %1495 = vmatmul.mubr.msk.f32.gmra.mxu0 %vm471_vm0, %v30_v31  ;;  %1558 = vmatmul.mubr.msk.f32.gmra.mxu1 %vm471_vm0, %v72_v32 }
  0x19   :  { %283 = vperm.xlu0 %1584, %v113_v33   ;;  %203 = vperm.xlu1 %1585, %v97_v34  }
  0x1a   :  { %1497 = vmatprep.mubr.msk.f32.mxu0 %vm471_vm0, %v31_v35  ;;  %1560 = vmatprep.mubr.msk.f32.mxu1 %vm471_vm0, %v73_v36 }
  0x1c   :  { %1498 = vmatmul.mubr.msk.f32.gmra.mxu0 %vm471_vm0, %v32_v37  ;;  %1561 = vmatmul.mubr.msk.f32.gmra.mxu1 %vm471_vm0, %v74_v38 }
  0x1d   :  { %278 = vperm.xlu0 %1584, %v112_v39   ;;  %198 = vperm.xlu1 %1585, %v96_v40  }
  0x1e   :  { %1500 = vmatprep.mubr.msk.f32.mxu0 %vm471_vm0, %v33_v41  ;;  %1563 = vmatprep.mubr.msk.f32.mxu1 %vm471_vm0, %v75_v42 }
  0x20   :  { %1501 = vmatmul.mubr.msk.f32.gmra.mxu0 %vm471_vm0, %v34_v43  ;;  %1564 = vmatmul.mubr.msk.f32.gmra.mxu1 %vm471_vm0, %v76_v44 }
  0x21   :  { %273 = vperm.xlu0 %1584, %v111_v45   ;;  %193 = vperm.xlu1 %1585, %v95_v46  }
  0x22   :  { %1503 = vmatprep.mubr.msk.f32.mxu0 %vm471_vm0, %v35_v47  ;;  %1566 = vmatprep.mubr.msk.f32.mxu1 %vm471_vm0, %v77_v48 }
  0x24   :  { %1504 = vmatmul.mubr.msk.f32.gmra.mxu0 %vm471_vm0, %v36_v49  ;;  %1567 = vmatmul.mubr.msk.f32.gmra.mxu1 %vm471_vm0, %v78_v50 }
  0x25   :  { %268 = vperm.xlu0 %1584, %v110_v51   ;;  %188 = vperm.xlu1 %1585, %v94_v52  }
  0x26   :  { %1506 = vmatprep.mubr.msk.f32.mxu0 %vm471_vm0, %v37_v53  ;;  %1569 = vmatprep.mubr.msk.f32.mxu1 %vm471_vm0, %v79_v54 }
  0x28   :  { %1507 = vmatmul.mubr.msk.f32.gmra.mxu0 %vm471_vm0, %v38_v55  ;;  %1570 = vmatmul.mubr.msk.f32.gmra.mxu1 %vm471_vm0, %v80_v56 }
  0x29   :  { %263 = vperm.xlu0 %1584, %v109_v57   ;;  %183 = vperm.xlu1 %1585, %v93_v58  }
  0x2a   :  { %1509 = vmatprep.mubr.msk.f32.mxu0 %vm471_vm0, %v39_v59  ;;  %1572 = vmatprep.mubr.msk.f32.mxu1 %vm471_vm0, %v81_v60 }
  0x2b   :  { %10 = vsyncpa [#allocation3], 0  ;;  %v42_v3 = vld [vmem:[%s2413_s1 + $0xa8] sm:$0xff]  ;;  %v84_v4 = vld [vmem:[%s2413_s1 + $0x1f8] sm:$0xff]  ;;  %s1609_s24 = smov [#allocation2]  }
  0x2c   :  { %1510 = vmatmul.mubr.msk.f32.gmra.mxu0 %vm471_vm0, %v40_v61  ;;  %1573 = vmatmul.mubr.msk.f32.gmra.mxu1 %vm471_vm0, %v82_v62  ;;  %v107_v5 = vld [vmem:[%s2414_s2 + $0xa0] sm:$0xff]  ;;  %v43_v7 = vld [vmem:[%s2413_s1 + $0xb0] sm:$0xff]  ;;  %v44_v8 = vld [vmem:[%s2413_s1 + $0xb8] sm:$0xff]  ;;  %s1270_s25 = sshll.u32 %s1609_s24, 4  ;;  %s1271_s25 = int_to_ptr.vmem [resolvable:$true] %s1270_s25 }
  0x2d   :  { %258 = vperm.xlu0 %1584, %v108_v63   ;;  %178 = vperm.xlu1 %1585, %v92_v0   ;;  %v91_v6 = vld [vmem:[%s2414_s2 + $0x20] sm:$0xff]  ;;  %v106_v9 = vld [vmem:[%s2414_s2 + $0x98] sm:$0xff]  ;;  %v46_v12 = vld [vmem:[%s2413_s1 + $0xc8] sm:$0xff]  ;;  %s1586_s26 = scalar_lea.vmem %s1271_s25, 128  ;;  %p1591_p1 = scmp.lt.s32.totalorder %s1271_s25, %s1271_s25 }
  0x2e   :  { %1512 = vmatprep.mubr.msk.f32.mxu0 %vm471_vm0, %v41_v1  ;;  %1575 = vmatprep.mubr.msk.f32.mxu1 %vm471_vm0, %v83_v2  ;;  %v90_v10 = vld [vmem:[%s2414_s2 + $0x18] sm:$0xff]  ;;  %v45_v11 = vld [vmem:[%s2413_s1 + $0xc0] sm:$0xff]  ;;  %v105_v13 = vld [vmem:[%s2414_s2 + $0x90] sm:$0xff]  ;;  %p1587_p0 = scmp.ne.s32.totalorder %s1271_s25, %s1586_s26  ;;  %p1592_p2 = scmp.lt.s32.totalorder %s1586_s26, %s1586_s26 }
  0x2f   :  { %v89_v14 = vld [vmem:[%s2414_s2 + $0x10] sm:$0xff]  ;;  %v48_v16 = vld [vmem:[%s2413_s1 + $0xd8] sm:$0xff]  ;;  %v104_v17 = vld [vmem:[%s2414_s2 + $0x88] sm:$0xff] }
  0x30   :  { %1513 = vmatmul.mubr.msk.f32.gmra.mxu0 %vm471_vm0, %v42_v3  ;;  %1576 = vmatmul.mubr.msk.f32.gmra.mxu1 %vm471_vm0, %v84_v4  ;;  %v47_v15 = vld [vmem:[%s2413_s1 + $0xd0] sm:$0xff]  ;;  %v88_v18 = vld [vmem:[%s2414_s2 + $0x8] sm:$0xff]  ;;  %v49_v19 = vld [vmem:[%s2413_s1 + $0xe0] sm:$0xff]  ;;  %p1593_p3 = por %p1592_p2, %p1591_p1 }
  0x31   :  { %253 = vperm.xlu0 %1584, %v107_v5   ;;  %173 = vperm.xlu1 %1585, %v91_v6   ;;  %v50_v20 = vld [vmem:[%s2413_s1 + $0xe8] sm:$0xff]  ;;  %v103_v21 = vld [vmem:[%s2414_s2 + $0x80] sm:$0xff]  ;;  %v51_v23 = vld [vmem:[%s2413_s1 + $0xf0] sm:$0xff] }
  0x32   :  { %1515 = vmatprep.mubr.msk.f32.mxu0 %vm471_vm0, %v43_v7  ;;  %v87_v22 = vld [vmem:[%s2414_s2] sm:$0xff]  ;;  %v52_v24 = vld [vmem:[%s2413_s1 + $0xf8] sm:$0xff]  ;;  %v54_v28 = vld [vmem:[%s2413_s1 + $0x108] sm:$0xff]  ;;  %p1594_p4 = pnand %p1593_p3, %p1587_p0 }
  0x33   :  { %v150_v25 = vld [vmem:[%s2414_s2 + $0x1f8] sm:$0xff]  ;;  %v53_v27 = vld [vmem:[%s2413_s1 + $0x100] sm:$0xff]  ;;  %v149_v29 = vld [vmem:[%s2414_s2 + $0x1f0] sm:$0xff] }
  0x34   :  { %1516 = vmatmul.mubr.msk.f32.gmra.mxu0 %vm471_vm0, %v44_v8  ;;  %v134_v26 = vld [vmem:[%s2414_s2 + $0x178] sm:$0xff]  ;;  %v133_v30 = vld [vmem:[%s2414_s2 + $0x170] sm:$0xff]  ;;  %v148_v33 = vld [vmem:[%s2414_s2 + $0x1e8] sm:$0xff] }
  0x35   :  { %248 = vperm.xlu0 %1584, %v106_v9   ;;  %168 = vperm.xlu1 %1585, %v90_v10   ;;  %v55_v31 = vld [vmem:[%s2413_s1 + $0x110] sm:$0xff]  ;;  %v56_v32 = vld [vmem:[%s2413_s1 + $0x118] sm:$0xff]  ;;  %v132_v34 = vld [vmem:[%s2414_s2 + $0x168] sm:$0xff] }
  0x36   :  { %1518 = vmatprep.mubr.msk.f32.mxu0 %vm471_vm0, %v45_v11  ;;  %v57_v35 = vld [vmem:[%s2413_s1 + $0x120] sm:$0xff]  ;;  %v58_v36 = vld [vmem:[%s2413_s1 + $0x128] sm:$0xff]  ;;  %v59_v39 = vld [vmem:[%s2413_s1 + $0x130] sm:$0xff] }
  0x37   :  { %v147_v37 = vld [vmem:[%s2414_s2 + $0x1e0] sm:$0xff]  ;;  %v60_v40 = vld [vmem:[%s2413_s1 + $0x138] sm:$0xff]  ;;  %v62_v44 = vld [vmem:[%s2413_s1 + $0x148] sm:$0xff] }
  0x38   :  { %1519 = vmatmul.mubr.msk.f32.gmra.mxu0 %vm471_vm0, %v46_v12  ;;  %v131_v38 = vld [vmem:[%s2414_s2 + $0x160] sm:$0xff]  ;;  %v146_v41 = vld [vmem:[%s2414_s2 + $0x1d8] sm:$0xff]  ;;  %v145_v45 = vld [vmem:[%s2414_s2 + $0x1d0] sm:$0xff] }
  0x39   :  { %243 = vperm.xlu0 %1584, %v105_v13   ;;  %163 = vperm.xlu1 %1585, %v89_v14   ;;  %v130_v42 = vld [vmem:[%s2414_s2 + $0x158] sm:$0xff]  ;;  %v61_v43 = vld [vmem:[%s2413_s1 + $0x140] sm:$0xff]  ;;  %v129_v46 = vld [vmem:[%s2414_s2 + $0x150] sm:$0xff] }
  0x3a   :  { %1521 = vmatprep.mubr.msk.f32.mxu0 %vm471_vm0, %v47_v15  ;;  %v144_v47 = vld [vmem:[%s2414_s2 + $0x1c8] sm:$0xff]  ;;  %v143_v49 = vld [vmem:[%s2414_s2 + $0x1c0] sm:$0xff]  ;;  %v142_v51 = vld [vmem:[%s2414_s2 + $0x1b8] sm:$0xff] }
  0x3b   :  { %v128_v48 = vld [vmem:[%s2414_s2 + $0x148] sm:$0xff]  ;;  %v127_v50 = vld [vmem:[%s2414_s2 + $0x140] sm:$0xff]  ;;  %v126_v52 = vld [vmem:[%s2414_s2 + $0x138] sm:$0xff] }
  0x3c   :  { %1522 = vmatmul.mubr.msk.f32.gmra.mxu0 %vm471_vm0, %v48_v16  ;;  %v141_v53 = vld [vmem:[%s2414_s2 + $0x1b0] sm:$0xff]  ;;  %v140_v55 = vld [vmem:[%s2414_s2 + $0x1a8] sm:$0xff]  ;;  %v139_v57 = vld [vmem:[%s2414_s2 + $0x1a0] sm:$0xff] }
  0x3d   :  { %238 = vperm.xlu0 %1584, %v104_v17   ;;  %158 = vperm.xlu1 %1585, %v88_v18   ;;  %v125_v54 = vld [vmem:[%s2414_s2 + $0x130] sm:$0xff]  ;;  %v124_v56 = vld [vmem:[%s2414_s2 + $0x128] sm:$0xff]  ;;  %v123_v58 = vld [vmem:[%s2414_s2 + $0x120] sm:$0xff] }
  0x3e   :  { %1524 = vmatprep.mubr.msk.f32.mxu0 %vm471_vm0, %v49_v19  ;;  %v138_v59 = vld [vmem:[%s2414_s2 + $0x198] sm:$0xff]  ;;  %v137_v61 = vld [vmem:[%s2414_s2 + $0x190] sm:$0xff]  ;;  %v136_v63 = vld [vmem:[%s2414_s2 + $0x188] sm:$0xff] }
  0x3f   :  { %v122_v60 = vld [vmem:[%s2414_s2 + $0x118] sm:$0xff]  ;;  %v121_v62 = vld [vmem:[%s2414_s2 + $0x110] sm:$0xff]  ;;  %v120_v0 = vld [vmem:[%s2414_s2 + $0x108] sm:$0xff] }
  0x40   :  { %1525 = vmatmul.mubr.msk.f32.gmra.mxu0 %vm471_vm0, %v50_v20  ;;  %v135_v1 = vld [vmem:[%s2414_s2 + $0x180] sm:$0xff]  ;;  %v1114_v17 = vld [vmem:[%s2415_s3 + $0x8] sm:$0xff] }
  0x41   :  { %233 = vperm.xlu0 %1584, %v103_v21   ;;  %153 = vperm.xlu1 %1585, %v87_v22   ;;  %v119_v2 = vld [vmem:[%s2414_s2 + $0x100] sm:$0xff] }
  0x42   :  { %1527 = vmatprep.mubr.msk.f32.mxu0 %vm471_vm0, %v51_v23  ;;  %v1117_v3 = vld [vmem:[%s2416_s4] sm:$0xff]  ;;  %1187 = vmatprep.mubr.f32.mxu1 %v1114_v17 }
  0x44   :  { %1528 = vmatmul.mubr.msk.f32.gmra.mxu0 %vm471_vm0, %v52_v24 }
  0x45   :  { %468 = vperm.xlu0 %1584, %v150_v25   ;;  %388 = vperm.xlu1 %1585, %v134_v26  }
  0x46   :  { %1530 = vmatprep.mubr.msk.f32.mxu0 %vm471_vm0, %v53_v27 }
  0x48   :  { %1531 = vmatmul.mubr.msk.f32.gmra.mxu0 %vm471_vm0, %v54_v28 }
  0x49   :  { %463 = vperm.xlu0 %1584, %v149_v29   ;;  %383 = vperm.xlu1 %1585, %v133_v30  }
  0x4a   :  { %1533 = vmatprep.mubr.msk.f32.mxu0 %vm471_vm0, %v55_v31 }
  0x4c   :  { %1534 = vmatmul.mubr.msk.f32.gmra.mxu0 %vm471_vm0, %v56_v32 }
  0x4d   :  { %458 = vperm.xlu0 %1584, %v148_v33   ;;  %378 = vperm.xlu1 %1585, %v132_v34  }
  0x4e   :  { %1536 = vmatprep.mubr.msk.f32.mxu0 %vm471_vm0, %v57_v35 }
  0x50   :  { %1537 = vmatmul.mubr.msk.f32.gmra.mxu0 %vm471_vm0, %v58_v36 }
  0x51   :  { %453 = vperm.xlu0 %1584, %v147_v37   ;;  %373 = vperm.xlu1 %1585, %v131_v38  }
  0x52   :  { %1539 = vmatprep.mubr.msk.f32.mxu0 %vm471_vm0, %v59_v39 }
  0x54   :  { %1540 = vmatmul.mubr.msk.f32.gmra.mxu0 %vm471_vm0, %v60_v40 }
  0x55   :  { %448 = vperm.xlu0 %1584, %v146_v41   ;;  %368 = vperm.xlu1 %1585, %v130_v42  }
  0x56   :  { %1542 = vmatprep.mubr.msk.f32.mxu0 %vm471_vm0, %v61_v43 }
  0x58   :  { %1543 = vmatmul.mubr.msk.f32.gmra.mxu0 %vm471_vm0, %v62_v44 }
  0x59   :  { %443 = vperm.xlu0 %1584, %v145_v45   ;;  %363 = vperm.xlu1 %1585, %v129_v46  }
  0x5d   :  { %438 = vperm.xlu0 %1584, %v144_v47   ;;  %358 = vperm.xlu1 %1585, %v128_v48  }
  0x61   :  { %433 = vperm.xlu0 %1584, %v143_v49   ;;  %353 = vperm.xlu1 %1585, %v127_v50  }
  0x65   :  { %428 = vperm.xlu0 %1584, %v142_v51   ;;  %348 = vperm.xlu1 %1585, %v126_v52  }
  0x69   :  { %423 = vperm.xlu0 %1584, %v141_v53   ;;  %343 = vperm.xlu1 %1585, %v125_v54  }
  0x6d   :  { %418 = vperm.xlu0 %1584, %v140_v55   ;;  %338 = vperm.xlu1 %1585, %v124_v56  }
  0x71   :  { %413 = vperm.xlu0 %1584, %v139_v57   ;;  %333 = vperm.xlu1 %1585, %v123_v58  }
  0x75   :  { %408 = vperm.xlu0 %1584, %v138_v59   ;;  %328 = vperm.xlu1 %1585, %v122_v60  }
  0x79   :  { %403 = vperm.xlu0 %1584, %v137_v61   ;;  %323 = vperm.xlu1 %1585, %v121_v62  }
  0x7d   :  { %398 = vperm.xlu0 %1584, %v136_v63   ;;  %318 = vperm.xlu1 %1585, %v120_v0  }
  0x7e   :  { %v2097_v4 = vpop.permute.xlu0 %308  ;;  %v2099_v5 = vpop.permute.xlu1 %303 }
  0x81   :  { %393 = vperm.xlu0 %1584, %v135_v1   ;;  %313 = vperm.xlu1 %1585, %v119_v2  }
  0x84   :  { %v2101_v6 = vpop.permute.xlu0 %228  ;;  %v2103_v7 = vpop.permute.xlu1 %223 }
  0x85   :  { %1120 = vperm.xlu0 %1584, %v1117_v3  }
  0x88   :  { %v2105_v8 = vpop.permute.xlu0 %298  ;;  %v2107_v9 = vpop.permute.xlu1 %218 }
  0x8c   :  { %v2109_v10 = vpop.permute.xlu0 %293  ;;  %v2111_v11 = vpop.permute.xlu1 %213 }
  0x90   :  { %v2113_v12 = vpop.permute.xlu0 %288  ;;  %v2115_v13 = vpop.permute.xlu1 %208 }
  0x94   :  { %v2117_v14 = vpop.permute.xlu0 %283  ;;  %v2119_v15 = vpop.permute.xlu1 %203 }
  0x98   :  { %v2121_v16 = vpop.permute.xlu0 %278  ;;  %v2126_v18 = vpop.permute.xlu1 %198 }
  0x9c   :  { %v2128_v19 = vpop.permute.xlu0 %273  ;;  %v2130_v20 = vpop.permute.xlu1 %193 }
  0xa0   :  { %v2132_v21 = vpop.permute.xlu0 %268  ;;  %v2134_v22 = vpop.permute.xlu1 %188 }
  0xa4   :  { %v2136_v23 = vpop.permute.xlu0 %263  ;;  %v2138_v24 = vpop.permute.xlu1 %183 }
  0xa8   :  { %v2140_v25 = vpop.permute.xlu0 %258  ;;  %v2142_v26 = vpop.permute.xlu1 %178 }
  0xac   :  { %v2144_v27 = vpop.permute.xlu0 %253  ;;  %v2148_v29 = vpop.permute.xlu1 %173 }
  0xb0   :  { %v2152_v31 = vpop.permute.xlu0 %248  ;;  %v2160_v35 = vpop.permute.xlu1 %168 }
  0xb4   :  { %v2164_v37 = vpop.permute.xlu0 %243  ;;  %v2172_v41 = vpop.permute.xlu1 %163 }
  0xb5   :  { %2423 = vst [vmem:[#allocation10_spill] sm:$0xff] %v2172_v41 }
  0xb8   :  { %v2178_v44 = vpop.permute.xlu0 %238  ;;  %v2186_v48 = vpop.permute.xlu1 %158 }
  0xb9   :  { %2425 = vst [vmem:[#allocation12_spill] sm:$0xff] %v2178_v44  ;;  %2427 = vst [vmem:[#allocation14_spill] sm:$0xff] %v2186_v48 }
  0xbc   :  { %v2190_v50 = vpop.permute.xlu0 %233  ;;  %v2196_v54 = vpop.permute.xlu1 %153 }
  0xbd   :  { %2428 = vst [vmem:[#allocation15_spill] sm:$0xff] %v2190_v50  ;;  %2430 = vst [vmem:[#allocation17_spill] sm:$0xff] %v2196_v54 }
  0xc0   :  { %v2200_v57 = vpop.permute.xlu0 %468  ;;  %v2204_v61 = vpop.permute.xlu1 %388 }
  0xc1   :  { %2432 = vst [vmem:[#allocation19_spill] sm:$0xff] %v2200_v57  ;;  %2434 = vst [vmem:[#allocation21_spill] sm:$0xff] %v2204_v61 }
  0xc4   :  { %v2208_v63 = vpop.permute.xlu0 %463  ;;  %v2216_v3 = vpop.permute.xlu1 %383 }
  0xc5   :  { %2436 = vst [vmem:[#allocation23_spill] sm:$0xff] %v2208_v63  ;;  %2439 = vst [vmem:[#allocation26_spill] sm:$0xff] %v2216_v3 }
  0xc8   :  { %v2146_v28 = vpop.f32.mrf.mxu0  ;;  %v2156_v33 = vpop.f32.mrf.mxu1 }
  0xc9   :  { %2418 = vst [vmem:[#allocation5_spill] sm:$0xff] %v2146_v28  ;;  %2420 = vst [vmem:[#allocation7_spill] sm:$0xff] %v2156_v33 }
  0xca   :  { %v2150_v30 = vpop.f32.mrf.mxu0  ;;  %v2166_v38 = vpop.f32.mrf.mxu1 }
  0xcb   :  { %2419 = vst [vmem:[#allocation6_spill] sm:$0xff] %v2150_v30  ;;  %2422 = vst [vmem:[#allocation9_spill] sm:$0xff] %v2166_v38 }
  0xcc   :  { %v2154_v32 = vpop.f32.mrf.mxu0  ;;  %v2174_v42 = vpop.f32.mrf.mxu1 }
  0xcd   :  { %2424 = vst [vmem:[#allocation11_spill] sm:$0xff] %v2174_v42 }
  0xce   :  { %v2158_v34 = vpop.f32.mrf.mxu0  ;;  %v2182_v46 = vpop.f32.mrf.mxu1 }
  0xcf   :  { %2421 = vst [vmem:[#allocation8_spill] sm:$0xff] %v2158_v34  ;;  %2426 = vst [vmem:[#allocation13_spill] sm:$0xff] %v2182_v46 }
  0xd0   :  { %v2162_v36 = vpop.f32.mrf.mxu0  ;;  %v2192_v51 = vpop.f32.mrf.mxu1 }
  0xd1   :  { %2429 = vst [vmem:[#allocation16_spill] sm:$0xff] %v2192_v51 }
  0xd2   :  { %v2168_v39 = vpop.f32.mrf.mxu0  ;;  %v2198_v55 = vpop.f32.mrf.mxu1 }
  0xd3   :  { %2431 = vst [vmem:[#allocation18_spill] sm:$0xff] %v2198_v55  ;;  %v2230_v55 = vpop.permute.xlu1 %378 }
  0xd4   :  { %v2170_v40 = vpop.f32.mrf.mxu0  ;;  %v2202_v59 = vpop.f32.mrf.mxu1  ;;  %2443 = vst [vmem:[#allocation30_spill] sm:$0xff] %v2230_v55 }
  0xd5   :  { %2433 = vst [vmem:[#allocation20_spill] sm:$0xff] %v2202_v59  ;;  %v2222_v59 = vpop.permute.xlu0 %458 }
  0xd6   :  { %v2176_v43 = vpop.f32.mrf.mxu0  ;;  %v2210_v0 = vpop.f32.mrf.mxu1  ;;  %2441 = vst [vmem:[#allocation28_spill] sm:$0xff] %v2222_v59 }
  0xd7   :  { %2437 = vst [vmem:[#allocation24_spill] sm:$0xff] %v2210_v0  ;;  %v2240_v61 = vpop.permute.xlu1 %373 }
  0xd8   :  { %v2180_v45 = vpop.f32.mrf.mxu0  ;;  %v2218_v17 = vpop.f32.mrf.mxu1  ;;  %2446 = vst [vmem:[#allocation33_spill] sm:$0xff] %v2240_v61 }
  0xd9   :  { %2440 = vst [vmem:[#allocation27_spill] sm:$0xff] %v2218_v17  ;;  %v2234_v63 = vpop.permute.xlu0 %453 }
  0xda   :  { %v2184_v47 = vpop.f32.mrf.mxu0  ;;  %v2226_v46 = vpop.f32.mrf.mxu1  ;;  %2444 = vst [vmem:[#allocation31_spill] sm:$0xff] %v2234_v63 }
  0xdb   :  { %2442 = vst [vmem:[#allocation29_spill] sm:$0xff] %v2226_v46 }
  0xdc   :  { %v2188_v49 = vpop.f32.mrf.mxu0  ;;  %v2236_v51 = vpop.f32.mrf.mxu1 }
  0xdd   :  { %2445 = vst [vmem:[#allocation32_spill] sm:$0xff] %v2236_v51  ;;  %v2244_v30 = vpop.permute.xlu0 %448 }
  0xde   :  { %v2194_v52 = vpop.f32.mrf.mxu0  ;;  %v2242_v59 = vpop.f32.mrf.mxu1  ;;  %2448 = vst [vmem:[#allocation35_spill] sm:$0xff] %v2244_v30 }
  0xdf   :  { %2447 = vst [vmem:[#allocation34_spill] sm:$0xff] %v2242_v59 }
  0xe0   :  { %v1502_v53 = vpop.f32.mrf.mxu0  ;;  %v2246_v54 = vpop.f32.mrf.mxu1 }
  0xe1   :  { %2449 = vst [vmem:[#allocation36_spill] sm:$0xff] %v2246_v54  ;;  %v2250_v63 = vpop.permute.xlu0 %443 }
  0xe2   :  { %v790_v56 = vpop.f32.mrf.mxu0  ;;  %2451 = vst [vmem:[#allocation38_spill] sm:$0xff] %v2250_v63  ;;  %v2252_v51 = vpop.f32.mrf.mxu1 }
  0xe3   :  { %2452 = vst [vmem:[#allocation39_spill] sm:$0xff] %v2252_v51  ;;  %v796_v51 = vadd.f32 %v1502_v53, %v2107_v9  ;;  %v786_v9 = vadd.f32 %v2188_v49, %v2115_v13  ;;  %v776_v13 = vadd.f32 %v2180_v45, %v2126_v18  ;;  %v766_v45 = vadd.f32 %v2170_v40, %v2134_v22 }
  0xe4   :  { %v1505_v58 = vpop.f32.mrf.mxu0  ;;  %v2258_v30 = vpop.f32.mrf.mxu1 }
  0xe5   :  { %v806_v48 = vadd.f32 %v1505_v58, %v2101_v6  ;;  %2454 = vst [vmem:[#allocation41_spill] sm:$0xff] %v2258_v30  ;;  %v2263_v41 = vpop.permute.xlu0 %438 }
  0xe6   :  { %v800_v60 = vpop.f32.mrf.mxu0  ;;  %v2268_v30 = vpop.f32.mrf.mxu1 }
  0xe7   :  { %v801_v54 = vadd.f32 %v800_v60, %v2103_v7  ;;  %v1064_v6 = vmax.f32 %v806_v48, 0.0  ;;  %v781_v48 = vadd.f32 %v2194_v52, %v2119_v15  ;;  %v771_v52 = vadd.f32 %v2184_v47, %v2130_v20 }
  0xe8   :  { %v2206_v62 = vpop.f32.mrf.mxu0  ;;  %v761_v60 = vadd.f32 %v2176_v43, %v2138_v24 }
  0xe9   :  { %2435 = vst [vmem:[#allocation22_spill] sm:$0xff] %v2206_v62 }
  0xea   :  { %v2212_v1 = vpop.f32.mrf.mxu0 }
  0xeb   :  { %2438 = vst [vmem:[#allocation25_spill] sm:$0xff] %v2212_v1  ;;  %v2248_v1 = vpop.permute.xlu1 %368 }
  0xec   :  { %v2214_v2 = vpop.f32.mrf.mxu0  ;;  %2450 = vst [vmem:[#allocation37_spill] sm:$0xff] %v2248_v1 }
  0xee   :  { %v2220_v38 = vpop.f32.mrf.mxu0 }
  0xef   :  { %v2255_v62 = vpop.permute.xlu1 %363 }
  0xf0   :  { %v2224_v33 = vpop.f32.mrf.mxu0  ;;  %2453 = vst [vmem:[#allocation40_spill] sm:$0xff] %v2255_v62 }
  0xf1   :  { %v836_v22 = vadd.f32 %v2224_v33, %v2140_v25  ;;  %v826_v33 = vadd.f32 %v2214_v2, %v2152_v31 }
  0xf2   :  { %v2228_v42 = vpop.f32.mrf.mxu0 }
  0xf3   :  { %v2270_v7 = vpop.permute.xlu1 %358  ;;  %v831_v24 = vadd.f32 %v2228_v42, %v2144_v27  ;;  %v746_v27 = vadd.f32 %v2154_v32, %v2160_v35  ;;  %v2459_v35 = vld [vmem:[#allocation14_spill] sm:$0xff] }
  0xf4   :  { %v2232_v0 = vpop.f32.mrf.mxu0 }
  0xf6   :  { %v2238_v3 = vpop.f32.mrf.mxu0 }
  0xf7   :  { %v2289_v49 = vpop.permute.xlu1 %353  ;;  %v841_v20 = vadd.f32 %v2238_v3, %v2136_v23  ;;  %v756_v23 = vadd.f32 %v2162_v36, %v2142_v26  ;;  %v751_v3 = vadd.f32 %v2168_v39, %v2148_v29  ;;  %v821_v29 = vadd.f32 %v2220_v38, %v2164_v37  ;;  %v2461_v38 = vld [vmem:[#allocation15_spill] sm:$0xff] }
  0xf8   :  { %v1520_v17 = vpop.f32.mrf.mxu0  ;;  %v1069_v39 = vmax.f32 %v831_v24, 0.0 }
  0xf9   :  { %v1071_v43 = vmax.f32 %v841_v20, 0.0  ;;  %v1054_v36 = vmax.f32 %v756_v23, 0.0  ;;  %v1053_v31 = vmax.f32 %v751_v3, 0.0  ;;  %v2468_v23 = vld [vmem:[#allocation23_spill] sm:$0xff]  ;;  %v2470_v3 = vld [vmem:[#allocation18_spill] sm:$0xff] }
  0xfa   :  { %v850_v57 = vpop.f32.mrf.mxu0 }
  0xfc   :  { %v1523_v46 = vpop.f32.mrf.mxu0 }
  0xfe   :  { %v860_v55 = vpop.f32.mrf.mxu0 }
 0x100   :  { %v1526_v50 = vpop.f32.mrf.mxu0 }
 0x101   :  { %v876_v1 = vadd.f32 %v1526_v50, %v2105_v8  ;;  %v866_v8 = vadd.f32 %v1523_v46, %v2113_v12  ;;  %v2282_v12 = vpop.f32.mrf.mxu1  ;;  %v856_v46 = vadd.f32 %v1520_v17, %v2121_v16  ;;  %v1055_v17 = vmax.f32 %v761_v60, 0.0  ;;  %v2466_v60 = vld [vmem:[#allocation21_spill] sm:$0xff] }
 0x102   :  { %v870_v28 = vpop.f32.mrf.mxu0 }
 0x103   :  { %v871_v58 = vadd.f32 %v870_v28, %v2109_v10  ;;  %v1062_v10 = vmax.f32 %v796_v51, 0.0  ;;  %v861_v28 = vadd.f32 %v860_v55, %v2117_v14  ;;  %v1076_v53 = vmax.f32 %v866_v8, 0.0  ;;  %v2294_v16 = vpop.f32.mrf.mxu1 }
 0x104   :  { %v1529_v61 = vpop.f32.mrf.mxu0  ;;  %v1060_v14 = vmax.f32 %v786_v9, 0.0  ;;  %v851_v51 = vadd.f32 %v850_v57, %v2128_v19  ;;  %v1059_v55 = vmax.f32 %v781_v48, 0.0  ;;  %v1058_v19 = vmax.f32 %v776_v13, 0.0  ;;  %v2458_v9 = vld [vmem:[#allocation22_spill] sm:$0xff] }
 0x105   :  { %v886_v59 = vadd.f32 %v1529_v61, %v2097_v4  ;;  %v791_v4 = vadd.f32 %v790_v56, %v2111_v11  ;;  %v1063_v61 = vmax.f32 %v801_v54, 0.0  ;;  %v1077_v11 = vmax.f32 %v871_v58, 0.0 }
 0x106   :  { %v880_v44 = vpop.f32.mrf.mxu0  ;;  %v1075_v15 = vmax.f32 %v861_v28, 0.0  ;;  %v846_v56 = vadd.f32 %v2232_v0, %v2132_v21  ;;  %v1073_v47 = vmax.f32 %v851_v51, 0.0  ;;  %v1057_v21 = vmax.f32 %v771_v52, 0.0  ;;  %v2464_v51 = vld [vmem:[#allocation6_spill] sm:$0xff] }
 0x107   :  { %v1080_v34 = vmax.f32 %v886_v59, 0.0  ;;  %v881_v63 = vadd.f32 %v880_v44, %v2099_v5  ;;  %v1078_v5 = vmax.f32 %v876_v1, 0.0  ;;  %v1061_v50 = vmax.f32 %v791_v4, 0.0  ;;  %v2455_v4 = vld [vmem:[#allocation10_spill] sm:$0xff] }
 0x108   :  { %v2273_v44 = vpop.f32.mrf.mxu0  ;;  %v1074_v59 = vmax.f32 %v856_v46, 0.0  ;;  %v1072_v40 = vmax.f32 %v846_v56, 0.0  ;;  %v1056_v1 = vmax.f32 %v766_v45, 0.0  ;;  %v1070_v58 = vmax.f32 %v836_v22, 0.0  ;;  %v2462_v46 = vld [vmem:[#allocation25_spill] sm:$0xff]  ;;  %v2465_v45 = vld [vmem:[#allocation19_spill] sm:$0xff] }
 0x109   :  { %v1079_v62 = vmax.f32 %v881_v63, 0.0  ;;  %1408 = vmatprep.subr.mxu1 %v1080_v34  ;;  %v2278_v34 = vpop.permute.xlu0 %433  ;;  %v2310_v63 = vpop.permute.xlu1 %348  ;;  %v1068_v28 = vmax.f32 %v826_v33, 0.0  ;;  %v1067_v13 = vmax.f32 %v821_v29, 0.0 }
 0x10a   :  { %1409 = vmatpush3.msra.mxu1 %v1064_v6  ;;  %v2285_v54 = vpop.f32.mrf.mxu0 }
 0x10b   :  { %1410 = vmatprep.subr.mxu1 %v1079_v62  ;;  %v2308_v62 = vpop.f32.mrf.mxu1 }
 0x10c   :  { %1411 = vmatpush3.msra.mxu1 %v1063_v61  ;;  %v2298_v18 = vpop.f32.mrf.mxu0  ;;  %v2456_v61 = vld [vmem:[#allocation8_spill] sm:$0xff] }
 0x10d   :  { %1412 = vmatprep.subr.mxu1 %v1078_v5  ;;  %v2302_v57 = vpop.permute.xlu0 %428  ;;  %v1030_v25 = vpop.f32.mrf.mxu1  ;;  %v741_v8 = vadd.f32 %v2456_v61, %v2455_v4  ;;  %v2457_v5 = vld [vmem:[#allocation12_spill] sm:$0xff]  ;;  %v1116_v4 = vld [vmem:[%s2415_s3 + $0x18] sm:$0xff]  ;;  %v2472_v61 = vld [vmem:[#allocation30_spill] sm:$0xff] }
 0x10e   :  { %1413 = vmatpush3.msra.mxu1 %v1062_v10  ;;  %v2314_v0 = vpop.f32.mrf.mxu0  ;;  %v2330_v42 = vpop.permute.xlu1 %343  ;;  %v816_v10 = vadd.f32 %v2458_v9, %v2457_v5  ;;  %v2474_v9 = vld [vmem:[#allocation31_spill] sm:$0xff] }
 0x10f   :  { %1414 = vmatprep.subr.mxu1 %v1077_v11  ;;  %v1577_v2 = vpop.f32.mrf.mxu1  ;;  %v2460_v11 = vld [vmem:[#allocation5_spill] sm:$0xff]  ;;  %v1051_v52 = vmax.f32 %v741_v8, 0.0  ;;  %v2473_v8 = vld [vmem:[#allocation11_spill] sm:$0xff] }
 0x110   :  { %1415 = vmatpush3.msra.mxu1 %v1061_v50  ;;  %v2326_v26 = vpop.f32.mrf.mxu0  ;;  %v736_v48 = vadd.f32 %v2460_v11, %v2459_v35  ;;  %v1052_v50 = vmax.f32 %v746_v27, 0.0  ;;  %v2471_v27 = vld [vmem:[#allocation28_spill] sm:$0xff]  ;;  %v2475_v35 = vld [vmem:[#allocation33_spill] sm:$0xff] }
 0x111   :  { %1416 = vmatprep.subr.mxu1 %v1076_v53  ;;  %v2322_v6 = vpop.permute.xlu0 %423  ;;  %v811_v53 = vadd.f32 %v2462_v46, %v2461_v38 }
 0x112   :  { %1417 = vmatpush3.msra.mxu1 %v1060_v14  ;;  %v2338_v32 = vpop.f32.mrf.mxu0  ;;  %v2463_v14 = vld [vmem:[#allocation17_spill] sm:$0xff]  ;;  %v2348_v56 = vpop.permute.xlu1 %338 }
 0x113   :  { %1418 = vmatprep.subr.mxu1 %v1075_v15  ;;  %v731_v15 = vadd.f32 %v2464_v51, %v2463_v14  ;;  %v2478_v14 = vld [vmem:[#allocation37_spill] sm:$0xff]  ;;  %v2479_v51 = vld [vmem:[#allocation7_spill] sm:$0xff] }
 0x114   :  { %1419 = vmatpush3.msra.mxu1 %v1059_v55  ;;  %v1040_v55 = vpop.f32.mrf.mxu1  ;;  %v1541_v20 = vpop.f32.mrf.mxu0 }
 0x115   :  { %1420 = vmatprep.subr.mxu1 %v1074_v59  ;;  %v2342_v37 = vpop.permute.xlu0 %418  ;;  %v1066_v59 = vmax.f32 %v816_v10, 0.0  ;;  %v1049_v24 = vmax.f32 %v731_v15, 0.0  ;;  %v1031_v10 = vadd.f32 %v1030_v25, %v2474_v9  ;;  %v946_v15 = vadd.f32 %v2479_v51, %v2478_v14 }
 0x116   :  { %1421 = vmatpush3.msra.mxu1 %v1058_v19  ;;  %v1046_v19 = vadd.f32 %v1577_v2, %v2465_v45  ;;  %v334_v5 = vpop.permute.xlu1 %333 }
 0x117   :  { %1422 = vmatprep.subr.mxu1 %v1073_v47  ;;  %v1050_v47 = vmax.f32 %v736_v48, 0.0 }
 0x118   :  { %1423 = vmatpush3.msra.mxu1 %v1057_v21  ;;  %v2467_v21 = vld [vmem:[#allocation16_spill] sm:$0xff]  ;;  %v1112_v29 = vmax.f32 %v1046_v19, 0.0 }
 0x119   :  { %1424 = vmatprep.subr.mxu1 %v1072_v40  ;;  %v966_v22 = vadd.f32 %v2467_v21, %v2466_v60  ;;  %v1065_v40 = vmax.f32 %v811_v53, 0.0  ;;  %v2356_v33 = vpop.permute.xlu0 %413  ;;  %v2481_v19 = vld [vmem:[#allocation40_spill] sm:$0xff] }
 0x11a   :  { %1425 = vmatpush3.msra.mxu1 %v1056_v1  ;;  %v1041_v1 = vadd.f32 %v1040_v55, %v2468_v23 }
 0x11b   :  { %1426 = vmatprep.subr.mxu1 %v1071_v43  ;;  %v2469_v43 = vld [vmem:[#allocation26_spill] sm:$0xff]  ;;  %v1096_v2 = vmax.f32 %v966_v22, 0.0 }
 0x11c   :  { %1427 = vmatpush3.msra.mxu1 %v1055_v17  ;;  %v961_v17 = vadd.f32 %v2470_v3, %v2469_v43 }
 0x11d   :  { %1428 = vmatprep.subr.mxu1 %v1070_v58  ;;  %v1113_v58 = vld [vmem:[%s2415_s3] sm:$0xff]  ;;  %v409_v25 = vpop.permute.xlu0 %408 }
 0x11e   :  { %1429 = vmatpush3.msra.mxu1 %v1054_v36  ;;  %v1036_v36 = vadd.f32 %v2308_v62, %v2471_v27  ;;  %v2476_v62 = vld [vmem:[#allocation13_spill] sm:$0xff]  ;;  %v1095_v48 = vmax.f32 %v961_v17, 0.0 }
 0x11f   :  { %1430 = vmatprep.subr.mxu1 %v1069_v39  ;;  %v920_v39 = vpop.f32.mrf.mxu0  ;;  %v951_v11 = vadd.f32 %v2476_v62, %v2475_v35  ;;  %v2488_v62 = vld [vmem:[#allocation27_spill] sm:$0xff] }
 0x120   :  { %1431 = vmatpush3.msra.mxu1 %v1053_v31  ;;  %v956_v31 = vadd.f32 %v2473_v8, %v2472_v61  ;;  %v1110_v46 = vmax.f32 %v1036_v36, 0.0  ;;  %v921_v8 = vadd.f32 %v920_v39, %v2330_v42  ;;  %v911_v42 = vadd.f32 %v2338_v32, %v334_v5  ;;  %v2490_v5 = vld [vmem:[#allocation20_spill] sm:$0xff] }
 0x121   :  { %1432 = vmatprep.subr.mxu1 %v1068_v28  ;;  %v1111_v28 = vmax.f32 %v1041_v1, 0.0  ;;  %v1544_v53 = vpop.f32.mrf.mxu0  ;;  %v1093_v45 = vmax.f32 %v951_v11, 0.0  ;;  %v1092_v1 = vmax.f32 %v946_v15, 0.0  ;;  %v404_v17 = vpop.permute.xlu0 %403  ;;  %v986_v11 = vadd.f32 %v2488_v62, %v409_v25  ;;  %v2491_v15 = vld [vmem:[#allocation24_spill] sm:$0xff] }
 0x122   :  { %1433 = vmatpush3.msra.mxu1 %v1052_v50  ;;  %v2477_v50 = vld [vmem:[#allocation35_spill] sm:$0xff]  ;;  %v1087_v39 = vmax.f32 %v921_v8, 0.0 }
 0x123   :  { %1434 = vmatprep.subr.mxu1 %v1067_v13  ;;  %v1026_v38 = vadd.f32 %v2282_v12, %v2477_v50  ;;  %v1094_v13 = vmax.f32 %v956_v31, 0.0  ;;  %v2483_v12 = vld [vmem:[#allocation41_spill] sm:$0xff]  ;;  %v930_v23 = vpop.f32.mrf.mxu0  ;;  %v1100_v32 = vmax.f32 %v986_v11, 0.0 }
 0x124   :  { %1435 = vmatpush3.msra.mxu1 %v1051_v52  ;;  %v2480_v52 = vld [vmem:[#allocation38_spill] sm:$0xff]  ;;  %v1016_v21 = vadd.f32 %v2483_v12, %v2263_v41  ;;  %v2484_v41 = vld [vmem:[#allocation36_spill] sm:$0xff] }
 0x125   :  { %1436 = vmatprep.subr.mxu1 %v1066_v59  ;;  %v1021_v55 = vadd.f32 %v2294_v16, %v2480_v52  ;;  %v1109_v59 = vmax.f32 %v1031_v10, 0.0  ;;  %v1108_v22 = vmax.f32 %v1026_v38, 0.0  ;;  %v1011_v16 = vadd.f32 %v2268_v30, %v2278_v34  ;;  %v399_v9 = vpop.permute.xlu0 %398 }
 0x126   :  { %1437 = vmatpush3.msra.mxu1 %v1050_v47  ;;  %v2482_v47 = vld [vmem:[#allocation9_spill] sm:$0xff]  ;;  %v1006_v27 = vadd.f32 %v2484_v41, %v2302_v57  ;;  %v1106_v36 = vmax.f32 %v1016_v21, 0.0 }
 0x127   :  { %1438 = vmatprep.subr.mxu1 %v1065_v40  ;;  %v941_v60 = vadd.f32 %v2482_v47, %v2481_v19  ;;  %v329_v40 = vpop.permute.xlu1 %328  ;;  %v1107_v43 = vmax.f32 %v1021_v55, 0.0  ;;  %v1105_v30 = vmax.f32 %v1011_v16, 0.0 }
 0x128   :  { %1439 = vmatpush3.msra.mxu1 %v1049_v24  ;;  %v936_v24 = vadd.f32 %v1544_v53, %v2270_v7  ;;  %v2485_v7 = vld [vmem:[#allocation39_spill] sm:$0xff]  ;;  %v1085_v53 = vmax.f32 %v911_v42, 0.0 }
 0x129   :  { %1188 = vmatmul.mubr.f32.vlgmr.msra.gmra.mxu1 %v1113_v58  ;;  %1443 = vmatprep.subr.mxu1 %v1112_v29  ;;  %v1091_v3 = vmax.f32 %v941_v60, 0.0  ;;  %v931_v58 = vadd.f32 %v930_v23, %v2289_v49  ;;  %v926_v29 = vadd.f32 %v1541_v20, %v2310_v63  ;;  %v1001_v61 = vadd.f32 %v2485_v7, %v2322_v6  ;;  %v2487_v6 = vld [vmem:[#allocation34_spill] sm:$0xff] }
 0x12a   :  { %1444 = vmatpush3.msra.mxu1 %v1096_v2  ;;  %1257 = vmatprep.mubr.f32.mxu1 %v1116_v4  ;;  %v1090_v4 = vmax.f32 %v936_v24, 0.0  ;;  %v1104_v49 = vmax.f32 %v1006_v27, 0.0  ;;  %v2486_v2 = vld [vmem:[#allocation32_spill] sm:$0xff]  ;;  %v916_v63 = vadd.f32 %v2326_v26, %v2348_v56  ;;  %v2489_v56 = vld [vmem:[#allocation29_spill] sm:$0xff] }
 0x12b   :  { %1445 = vmatprep.subr.mxu1 %v1111_v28  ;;  %v324_v34 = vpop.permute.xlu1 %323  ;;  %v1089_v31 = vmax.f32 %v931_v58, 0.0  ;;  %v996_v57 = vadd.f32 %v2486_v2, %v2342_v37  ;;  %v1088_v20 = vmax.f32 %v926_v29, 0.0  ;;  %v1103_v10 = vmax.f32 %v1001_v61, 0.0 }
 0x12c   :  { %1446 = vmatpush3.msra.mxu1 %v1095_v48  ;;  %v991_v28 = vadd.f32 %v2487_v6, %v2356_v33  ;;  %v906_v48 = vadd.f32 %v2298_v18, %v329_v40  ;;  %v1086_v50 = vmax.f32 %v916_v63, 0.0  ;;  %v981_v38 = vadd.f32 %v2489_v56, %v404_v17 }
 0x12d   :  { %1447 = vmatprep.subr.mxu1 %v1110_v46  ;;  %v1102_v35 = vmax.f32 %v996_v57, 0.0  ;;  %v394_v46 = vpop.permute.xlu0 %393  ;;  %v901_v33 = vadd.f32 %v2314_v0, %v324_v34 }
 0x12e   :  { %1448 = vmatpush3.msra.mxu1 %v1094_v13  ;;  %v1101_v26 = vmax.f32 %v991_v28, 0.0  ;;  %v976_v13 = vadd.f32 %v2490_v5, %v399_v9  ;;  %v1084_v51 = vmax.f32 %v906_v48, 0.0  ;;  %v1099_v18 = vmax.f32 %v981_v38, 0.0 }
 0x12f   :  { %1449 = vmatprep.subr.mxu1 %v1109_v59  ;;  %v319_v37 = vpop.permute.xlu1 %318  ;;  %v971_v25 = vadd.f32 %v2491_v15, %v394_v46  ;;  %v1083_v59 = vmax.f32 %v901_v33, 0.0 }
 0x130   :  { %1450 = vmatpush3.msra.mxu1 %v1093_v45  ;;  %v896_v14 = vadd.f32 %v2273_v44, %v319_v37  ;;  %v1098_v0 = vmax.f32 %v976_v13, 0.0  ;;  %v1115_v44 = vld [vmem:[%s2415_s3 + $0x10] sm:$0xff] }
 0x131   :  { %1451 = vmatprep.subr.mxu1 %v1108_v22  ;;  %v1097_v19 = vmax.f32 %v971_v25, 0.0  ;;  %v1121_v22 = vpop.permute.xlu0 %1120 }
 0x132   :  { %1452 = vmatpush3.msra.mxu1 %v1092_v1  ;;  %v1082_v45 = vmax.f32 %v896_v14, 0.0 }
 0x133   :  { %1453 = vmatprep.subr.mxu1 %v1107_v43  ;;  %v314_v52 = vpop.permute.xlu1 %313 }
 0x134   :  { %1454 = vmatpush3.msra.mxu1 %v1091_v3  ;;  %v891_v55 = vadd.f32 %v2285_v54, %v314_v52 }
 0x135   :  { %1455 = vmatprep.subr.mxu1 %v1106_v36 }
 0x136   :  { %1456 = vmatpush3.msra.mxu1 %v1090_v4  ;;  %v1081_v47 = vmax.f32 %v891_v55, 0.0 }
 0x137   :  { %1457 = vmatprep.subr.mxu1 %v1105_v30 }
 0x138   :  { %1458 = vmatpush3.msra.mxu1 %v1089_v31 }
 0x139   :  { %1459 = vmatprep.subr.mxu1 %v1104_v49 }
 0x13a   :  { %1460 = vmatpush3.msra.mxu1 %v1088_v20 }
 0x13b   :  { %1461 = vmatprep.subr.mxu1 %v1103_v10 }
 0x13c   :  { %1462 = vmatpush3.msra.mxu1 %v1087_v39 }
 0x13d   :  { %1463 = vmatprep.subr.mxu1 %v1102_v35 }
 0x13e   :  { %1464 = vmatpush3.msra.mxu1 %v1086_v50 }
 0x13f   :  { %1465 = vmatprep.subr.mxu1 %v1101_v26 }
 0x140   :  { %1466 = vmatpush3.msra.mxu1 %v1085_v53 }
 0x141   :  { %1467 = vmatprep.subr.mxu1 %v1100_v32 }
 0x142   :  { %1468 = vmatpush3.msra.mxu1 %v1084_v51 }
 0x143   :  { %1469 = vmatprep.subr.mxu1 %v1099_v18 }
 0x144   :  { %1470 = vmatpush3.msra.mxu1 %v1083_v59 }
 0x145   :  { %1471 = vmatprep.subr.mxu1 %v1098_v0 }
 0x146   :  { %1472 = vmatpush3.msra.mxu1 %v1082_v45 }
 0x147   :  { %1473 = vmatprep.subr.mxu1 %v1097_v19 }
 0x148   :  { %1474 = vmatpush3.msra.mxu1 %v1081_v47 }
 0x149   :  { %1258 = vmatmul.mubr.f32.vlgmr.msra.gmra.mxu1 %v1115_v44 }
 0x1e9   :  { %v1440_v60 = vpop.f32.mrf.mxu1 }
 0x1eb   :  { %v1441_v12 = vpop.f32.mrf.mxu1 }
 0x1ec   :  { %v1442_v54 = vadd.f32 %v1441_v12, %v1440_v60 }
 0x1ee   :  { %v1190_v23 = vadd.f32 %v1442_v54, %v1121_v22 }
 0x209   :  { %v1475_v21 = vpop.f32.mrf.mxu1 }
 0x20b   :  { %v1476_v40 = vpop.f32.mrf.mxu1 }
 0x20c   :  { %v1477_v1 = vadd.f32 %v1476_v40, %v1475_v21 }
 0x20e   :  { %v1260_v24 = vadd.f32 %v1477_v1, %v1190_v23 }
 0x210   :  { %1263 = vst [vmem:[#allocation2] sm:$0xff] %v1260_v24 }
 0x211   :  { %1597 = shalt.err (!%p1594_p4)
}
 0x212   :  { %1273 = dma.vmem_to_hbm [thread:$0]  %s1271_s25, 128, %s2417_s5, [#allocation3]  }
 0x213   :  { %1606 = dma.done.wait [#allocation3], 128  }
 0x214   :  { %1607 = vsyncadd [#allocation3], 4294967168 }
 0x215   :  { %1277 = vsyncpa [#allocation3], 1 }

</bundles_post_ra>
